<compile_context>
chip_gen: v5e
topology: v5e:2x2
jax: 0.10.0
libtpu: 0.0.40
codegen_flags: <defaults>
</compile_context>

<pallas_src>
import functools

import numpy as np
import jax
import jax.numpy as jnp
from jax import lax
from jax.experimental import pallas as pl
from jax.experimental.pallas import tpu as pltpu


# ---------------------------------------------------------------------------
# static shape helpers
# ---------------------------------------------------------------------------
def _round_up(a, m):
    return (a + m - 1) // m * m


def _cdiv(a, m):
    return (a + m - 1) // m


def _derive_dims(L):
    """Static sizes implied by the PyTorch module for input length L."""
    L1 = (L + 2 * 1 - 5) // 2 + 1          # conv1: k=5, s=2, p=1
    L2 = L1 // 2                           # pool1: k=2, s=2
    L3 = (L2 + 2 * 1 - 5) // 1 + 1         # conv2: k=5, s=1, p=1
    L4 = L3 // 2                           # pool2
    assert L4 >= 1, "input length too small for this network"
    L4pad = _round_up(L4, 128)             # lane-aligned pooled width
    N1 = L4pad + 2                         # width of the phase-split h1 buffers
    W = _round_up(max(_cdiv(L + 10, 8), N1 + 2), 128)   # 8-phase input width
    return dict(L1=L1, L2=L2, L3=L3, L4=L4, L4pad=L4pad, N1=N1, W=W)


# ---------------------------------------------------------------------------
# fused Pallas kernel: conv1 + relu + pool1 + conv2 + relu + pool2 + fc
# ---------------------------------------------------------------------------
def encoder_kernel(xq_ref, w1_ref, b1_ref, w2s_ref, b2_ref, wfc_ref, bfc_ref,
                   out_ref, *, L2, L4pad, N1):
    """One batch element end-to-end, everything stays in VMEM.

    xq_ref : (1, 8, W)        8-phase input, xq[p, w] = x_pad[8w + p - 8]
    w1_ref : (C1, 5)          conv1 weight (Cin=1)
    b1_ref : (C1, 1)
    w2s_ref: (3, 2*C2, 2*C1)  shift-grouped conv2 weight (see prepare_params)
    b2_ref : (C2, 1)
    wfc_ref: (NC, C2, L4pad)  FC weight, channel-major, zero-padded on time
    bfc_ref: (1, NCpad)       FC bias, zero-padded on lanes
    out_ref: (1, 1, NCpad)    logits for this batch element (cols >= NC are 0)
    """
    xq = xq_ref[0]                       # (8, W)
    w1 = w1_ref[...]                     # (C1, 5)
    b1 = b1_ref[...]                     # (C1, 1)
    C1 = w1.shape[0]
    C2 = b2_ref.shape[0]
    NC = wfc_ref.shape[0]

    # --- conv1 taps: 11 unique rows, tap[m][0, w] = x_pad[8w + m], m = -4..6 ---
    taps = {}
    for m in range(-4, 7):
        q = m + 8
        row, off = q % 8, q // 8
        taps[m] = xq[row:row + 1, off:off + N1]              # (1, N1)

    def y1_phase(j):
        # conv1 output y1[4w + j] for all channels: (C1, N1).  VPU broadcast FMAs.
        acc = b1
        for k in range(5):
            acc = acc + w1[:, k:k + 1] * taps[2 * j + k]
        return acc

    # phase split of the zero-padded pool1 output h1p (pad=1 for conv2):
    #   HA[v] = h1p[2v]   = relu(max(y1[4v-2], y1[4v-1]))
    #   HB[v] = h1p[2v+1] = relu(max(y1[4v  ], y1[4v+1]))
    HA = jnp.maximum(jnp.maximum(y1_phase(-2), y1_phase(-1)), 0.0)
    HB = jnp.maximum(jnp.maximum(y1_phase(0), y1_phase(1)), 0.0)

    lane = lax.broadcasted_iota(jnp.int32, (C1, N1), 1)
    HA = jnp.where((lane >= 1) & (2 * lane <= L2), HA, 0.0)
    HB = jnp.where(2 * lane < L2, HB, 0.0)

    # --- conv2 + pool2: 3 shift-grouped MXU matmuls (no Pe/Po/P assembly) ------
    H = jnp.concatenate([HA, HB], axis=0).astype(w2s_ref.dtype)      # (2*C1, N1)
    Y = jnp.dot(w2s_ref[0], H[:, 0:L4pad], preferred_element_type=jnp.float32)
    Y = Y + jnp.dot(w2s_ref[1], H[:, 1:1 + L4pad], preferred_element_type=jnp.float32)
    Y = Y + jnp.dot(w2s_ref[2], H[:, 2:2 + L4pad], preferred_element_type=jnp.float32)
    # rows 0..C2-1 are the even pooled branch, rows C2..2*C2-1 the odd branch
    h2 = jnp.maximum(jnp.maximum(Y[:C2], Y[C2:]) + b2_ref[...], 0.0)  # (C2, L4pad)
    # columns >= L4 hold junk but hit zero-padded wfc columns below -> no effect.

    # --- fused FC: logits[n] = sum(wfc[n] * h2) + bfc[n]  (NC tiny -> VPU) -----
    NCpad = out_ref.shape[-1]
    lane2 = lax.broadcasted_iota(jnp.int32, (1, NCpad), 1)
    out_row = bfc_ref[...]                                            # (1, NCpad)
    for n in range(NC):
        prt = jnp.sum(wfc_ref[n] * h2, axis=1, keepdims=True)        # (C2, 1)
        s_n = jnp.sum(prt, axis=0, keepdims=True)                    # (1, 1)
        out_row = out_row + jnp.where(lane2 == n, s_n, 0.0)
    out_ref[0] = out_row


def encoder_pallas(XP, prep, *, L2, L4pad):
    B, _, W = XP.shape
    w1m, b1c, w2s, b2c, wfc, bfc_row = (
        prep[k] for k in ("w1m", "b1c", "w2s", "b2c", "wfc", "bfc"))
    C1 = w1m.shape[0]
    C2 = b2c.shape[0]
    NC = wfc.shape[0]
    NCpad = bfc_row.shape[1]
    N1 = L4pad + 2
    kernel = functools.partial(encoder_kernel, L2=L2, L4pad=L4pad, N1=N1)
    return pl.pallas_call(
        kernel,
        out_shape=jax.ShapeDtypeStruct((B, 1, NCpad), jnp.float32),
        grid=(B,),
        in_specs=[
            pl.BlockSpec((1, 8, W), lambda b: (b, 0, 0)),
            pl.BlockSpec((C1, 5), lambda b: (0, 0)),
            pl.BlockSpec((C1, 1), lambda b: (0, 0)),
            pl.BlockSpec((3, 2 * C2, 2 * C1), lambda b: (0, 0, 0)),
            pl.BlockSpec((C2, 1), lambda b: (0, 0)),
            pl.BlockSpec((NC, C2, L4pad), lambda b: (0, 0, 0)),   # resident in VMEM
            pl.BlockSpec((1, NCpad), lambda b: (0, 0)),
        ],
        out_specs=pl.BlockSpec((1, 1, NCpad), lambda b: (b, 0, 0)),
        compiler_params=pltpu.CompilerParams(dimension_semantics=("parallel",)),
    )(XP, w1m, b1c, w2s, b2c, wfc, bfc_row)


# ---------------------------------------------------------------------------
# parameter prep (once, outside the hot path) and forward
# ---------------------------------------------------------------------------
def prepare_params(params, L, conv2_dtype=jnp.float32):
    d = _derive_dims(L)
    L4, L4pad = d["L4"], d["L4pad"]
    W1, b1, W2, b2, Wfc, bfc = (params[k] for k in ("W1", "b1", "W2", "b2", "Wfc", "bfc"))
    C1, Cin, K1 = W1.shape
    C2, _, K2 = W2.shape
    NC = Wfc.shape[0]
    NCpad = _round_up(NC, 128)
    assert Cin == 1 and K1 == 5 and K2 == 5 and Wfc.shape[1] == C2 * L4

    w1m = jnp.asarray(W1[:, 0, :], jnp.float32)                       # (C1, 5)
    b1c = jnp.asarray(b1, jnp.float32).reshape(C1, 1)
    b2c = jnp.asarray(b2, jnp.float32).reshape(C2, 1)

    # shift-grouped conv2 weights (3, 2*C2, 2*C1):
    #   H_s = [HA[:, u+s]; HB[:, u+s]];  Ye = sum_s We[s] @ H_s;  Yo = sum_s Wo[s] @ H_s
    W2f = jnp.asarray(W2, jnp.float32)                                # (C2, C1, 5)
    Z = jnp.zeros((C2, C1), jnp.float32)
    tap = lambda k: W2f[:, :, k]
    We = [jnp.concatenate([tap(0), tap(1)], axis=1),
          jnp.concatenate([tap(2), tap(3)], axis=1),
          jnp.concatenate([tap(4), Z], axis=1)]
    Wo = [jnp.concatenate([Z, tap(0)], axis=1),
          jnp.concatenate([tap(1), tap(2)], axis=1),
          jnp.concatenate([tap(3), tap(4)], axis=1)]
    w2s = jnp.stack([jnp.concatenate([We[s], Wo[s]], axis=0) for s in range(3)],
                    axis=0).astype(conv2_dtype)                       # (3, 2*C2, 2*C1)

    # FC weight: channel-major (c*L4 + t) flatten, zero-padded along time to L4pad
    wfc = jnp.pad(jnp.asarray(Wfc, jnp.float32).reshape(NC, C2, L4),
                  ((0, 0), (0, 0), (0, L4pad - L4)))                  # (NC, C2, L4pad)
    bfc_row = jnp.pad(jnp.asarray(bfc, jnp.float32).reshape(1, NC),
                      ((0, 0), (0, NCpad - NC)))                      # (1, NCpad)
    return {"w1m": w1m, "b1c": b1c, "w2s": w2s, "b2c": b2c, "wfc": wfc, "bfc": bfc_row}


def audio_encoder_forward(x, prep):
    B, Cin, L = x.shape
    assert Cin == 1
    d = _derive_dims(L)
    W = d["W"]

    # 8-phase layout of the padded input: XP[b, p, w] = x_pad[8w + p - 8]
    # (9 leading zeros = 8 phase-alignment zeros + the conv1 left pad; zeros after)
    xrow = x[:, 0, :]
    xq = jnp.pad(xrow, ((0, 0), (9, 8 * W - L - 9)))
    XP = jnp.transpose(xq.reshape(B, W, 8), (0, 2, 1))        # (B, 8, W)

    logits_p = encoder_pallas(XP, prep, L2=d["L2"], L4pad=d["L4pad"])  # (B,1,NCpad)
    NC = prep["wfc"].shape[0]
    return logits_p[:, 0, :NC]


# ---------------------------------------------------------------------------
# Pure-JAX reference (mirrors the PyTorch forward exactly)
# ---------------------------------------------------------------------------
def reference_forward(x, params):
    W1, b1, W2, b2, Wfc, bfc = (params[k] for k in ("W1", "b1", "W2", "b2", "Wfc", "bfc"))
    dn = ("NCH", "OIH", "NCH")
    y = lax.conv_general_dilated(x, W1, window_strides=(2,), padding=[(1, 1)],
                                 dimension_numbers=dn)
    y = jax.nn.relu(y + b1[None, :, None])
    y = lax.reduce_window(y, -jnp.inf, lax.max, (1, 1, 2), (1, 1, 2), "VALID")
    y = lax.conv_general_dilated(y, W2, window_strides=(1,), padding=[(1, 1)],
                                 dimension_numbers=dn)
    y = jax.nn.relu(y + b2[None, :, None])
    y = lax.reduce_window(y, -jnp.inf, lax.max, (1, 1, 2), (1, 1, 2), "VALID")
    y = y.reshape(y.shape[0], -1)
    return y @ Wfc.T + bfc


# ---------------------------------------------------------------------------
if __name__ == "__main__":
    B, Cin = 2, 1
    num_classes = 2
    key = jax.random.PRNGKey(0)

    # L=128 -> L2 odd / L4 even; L=132 -> L2 even / L4 odd (covers both parities).
    for L in (128, 132):
        d = _derive_dims(L)
        fc_in = 16 * d["L4"]       # analogue of 16*3998 at the real L=32000

        key, k1, k2, k3, k4, k5, k6, kx = jax.random.split(key, 8)
        params = {
            "W1": jax.random.normal(k1, (8, Cin, 5), jnp.float32) * 0.1,
            "b1": jax.random.normal(k2, (8,), jnp.float32) * 0.1,
            "W2": jax.random.normal(k3, (16, 8, 5), jnp.float32) * 0.1,
            "b2": jax.random.normal(k4, (16,), jnp.float32) * 0.1,
            "Wfc": jax.random.normal(k5, (num_classes, fc_in), jnp.float32) * 0.05,
            "bfc": jax.random.normal(k6, (num_classes,), jnp.float32) * 0.05,
        }
        x = jax.random.normal(kx, (B, Cin, L), jnp.float32)

        prep = prepare_params(params, L)
        out = jax.block_until_ready(jax.jit(audio_encoder_forward)(x, prep))

        ref = jax.block_until_ready(reference_forward(x, params))
        np.testing.assert_allclose(np.asarray(out), np.asarray(ref),
                                   rtol=5e-3, atol=5e-3)
        assert out.shape == (B, num_classes)

    print("KERNEL_OK")
</pallas_src>

<mosaic_0001>
module attributes {stable_mosaic.version = 11 : i64} {
  func.func @encoder_kernel(%arg0: i32, %arg1: memref<1x8x256xf32, #tpu.memory_space<vmem>>, %arg2: memref<8x5xf32, #tpu.memory_space<vmem>>, %arg3: memref<8x1xf32, #tpu.memory_space<vmem>>, %arg4: memref<3x32x16xf32, #tpu.memory_space<vmem>>, %arg5: memref<16x1xf32, #tpu.memory_space<vmem>>, %arg6: memref<2x16x128xf32, #tpu.memory_space<vmem>>, %arg7: memref<1x128xf32, #tpu.memory_space<vmem>>, %arg8: memref<1x1x128xf32, #tpu.memory_space<vmem>>) attributes {dimension_semantics = [#tpu.dimension_semantics<parallel>], iteration_bounds = array<i64: 2>, scalar_prefetch = 0 : i64, scratch_operands = 0 : i64, tpu.core_type = #tpu.core_type<tc>, window_params = [{transform_indices = @transform_0, window_bounds = array<i64: 1, 8, 256>}, {pipeline_mode = #tpu.pipeline_mode<synchronous>, transform_indices = @transform_1, window_bounds = array<i64: 8, 5>}, {pipeline_mode = #tpu.pipeline_mode<synchronous>, transform_indices = @transform_2, window_bounds = array<i64: 8, 1>}, {pipeline_mode = #tpu.pipeline_mode<synchronous>, transform_indices = @transform_3, window_bounds = array<i64: 3, 32, 16>}, {pipeline_mode = #tpu.pipeline_mode<synchronous>, transform_indices = @transform_4, window_bounds = array<i64: 16, 1>}, {pipeline_mode = #tpu.pipeline_mode<synchronous>, transform_indices = @transform_5, window_bounds = array<i64: 2, 16, 128>}, {pipeline_mode = #tpu.pipeline_mode<synchronous>, transform_indices = @transform_6, window_bounds = array<i64: 1, 128>}, {transform_indices = @transform_7, window_bounds = array<i64: 1, 1, 128>}]} {
    %c0 = arith.constant 0 : index
    %c0_0 = arith.constant 0 : index
    %c0_1 = arith.constant 0 : index
    %0 = vector.load %arg1[%c0, %c0_0, %c0_1] : memref<1x8x256xf32, #tpu.memory_space<vmem>>, vector<1x8x256xf32>
    %1 = vector.shape_cast %0 : vector<1x8x256xf32> to vector<8x256xf32>
    %c0_2 = arith.constant 0 : index
    %c0_3 = arith.constant 0 : index
    %2 = vector.load %arg2[%c0_2, %c0_3] : memref<8x5xf32, #tpu.memory_space<vmem>>, vector<8x5xf32>
    %c0_4 = arith.constant 0 : index
    %c0_5 = arith.constant 0 : index
    %3 = vector.load %arg3[%c0_4, %c0_5] : memref<8x1xf32, #tpu.memory_space<vmem>>, vector<8x1xf32>
    %4 = vector.extract_strided_slice %1 {offsets = [4, 0], sizes = [1, 130], strides = [1, 1]} : vector<8x256xf32> to vector<1x130xf32>
    %5 = vector.extract_strided_slice %1 {offsets = [5, 0], sizes = [1, 130], strides = [1, 1]} : vector<8x256xf32> to vector<1x130xf32>
    %6 = vector.extract_strided_slice %1 {offsets = [6, 0], sizes = [1, 130], strides = [1, 1]} : vector<8x256xf32> to vector<1x130xf32>
    %7 = vector.extract_strided_slice %1 {offsets = [7, 0], sizes = [1, 130], strides = [1, 1]} : vector<8x256xf32> to vector<1x130xf32>
    %8 = vector.extract_strided_slice %1 {offsets = [0, 1], sizes = [1, 130], strides = [1, 1]} : vector<8x256xf32> to vector<1x130xf32>
    %9 = vector.extract_strided_slice %1 {offsets = [1, 1], sizes = [1, 130], strides = [1, 1]} : vector<8x256xf32> to vector<1x130xf32>
    %10 = vector.extract_strided_slice %1 {offsets = [2, 1], sizes = [1, 130], strides = [1, 1]} : vector<8x256xf32> to vector<1x130xf32>
    %11 = vector.extract_strided_slice %1 {offsets = [3, 1], sizes = [1, 130], strides = [1, 1]} : vector<8x256xf32> to vector<1x130xf32>
    %12 = vector.extract_strided_slice %1 {offsets = [4, 1], sizes = [1, 130], strides = [1, 1]} : vector<8x256xf32> to vector<1x130xf32>
    %13 = vector.extract_strided_slice %1 {offsets = [5, 1], sizes = [1, 130], strides = [1, 1]} : vector<8x256xf32> to vector<1x130xf32>
    %14 = vector.extract_strided_slice %1 {offsets = [6, 1], sizes = [1, 130], strides = [1, 1]} : vector<8x256xf32> to vector<1x130xf32>
    %15 = vector.extract_strided_slice %2 {offsets = [0, 0], sizes = [8, 1], strides = [1, 1]} : vector<8x5xf32> to vector<8x1xf32>
    %16 = vector.broadcast %15 : vector<8x1xf32> to vector<8x130xf32>
    %17 = vector.broadcast %4 : vector<1x130xf32> to vector<8x130xf32>
    %18 = arith.mulf %16, %17 : vector<8x130xf32>
    %19 = vector.broadcast %3 : vector<8x1xf32> to vector<8x130xf32>
    %20 = arith.addf %19, %18 : vector<8x130xf32>
    %21 = vector.extract_strided_slice %2 {offsets = [0, 1], sizes = [8, 1], strides = [1, 1]} : vector<8x5xf32> to vector<8x1xf32>
    %22 = vector.broadcast %21 : vector<8x1xf32> to vector<8x130xf32>
    %23 = vector.broadcast %5 : vector<1x130xf32> to vector<8x130xf32>
    %24 = arith.mulf %22, %23 : vector<8x130xf32>
    %25 = arith.addf %20, %24 : vector<8x130xf32>
    %26 = vector.extract_strided_slice %2 {offsets = [0, 2], sizes = [8, 1], strides = [1, 1]} : vector<8x5xf32> to vector<8x1xf32>
    %27 = vector.broadcast %26 : vector<8x1xf32> to vector<8x130xf32>
    %28 = vector.broadcast %6 : vector<1x130xf32> to vector<8x130xf32>
    %29 = arith.mulf %27, %28 : vector<8x130xf32>
    %30 = arith.addf %25, %29 : vector<8x130xf32>
    %31 = vector.extract_strided_slice %2 {offsets = [0, 3], sizes = [8, 1], strides = [1, 1]} : vector<8x5xf32> to vector<8x1xf32>
    %32 = vector.broadcast %31 : vector<8x1xf32> to vector<8x130xf32>
    %33 = vector.broadcast %7 : vector<1x130xf32> to vector<8x130xf32>
    %34 = arith.mulf %32, %33 : vector<8x130xf32>
    %35 = arith.addf %30, %34 : vector<8x130xf32>
    %36 = vector.extract_strided_slice %2 {offsets = [0, 4], sizes = [8, 1], strides = [1, 1]} : vector<8x5xf32> to vector<8x1xf32>
    %37 = vector.broadcast %36 : vector<8x1xf32> to vector<8x130xf32>
    %38 = vector.broadcast %8 : vector<1x130xf32> to vector<8x130xf32>
    %39 = arith.mulf %37, %38 : vector<8x130xf32>
    %40 = arith.addf %35, %39 : vector<8x130xf32>
    %41 = vector.extract_strided_slice %2 {offsets = [0, 0], sizes = [8, 1], strides = [1, 1]} : vector<8x5xf32> to vector<8x1xf32>
    %42 = vector.broadcast %41 : vector<8x1xf32> to vector<8x130xf32>
    %43 = vector.broadcast %6 : vector<1x130xf32> to vector<8x130xf32>
    %44 = arith.mulf %42, %43 : vector<8x130xf32>
    %45 = vector.broadcast %3 : vector<8x1xf32> to vector<8x130xf32>
    %46 = arith.addf %45, %44 : vector<8x130xf32>
    %47 = vector.extract_strided_slice %2 {offsets = [0, 1], sizes = [8, 1], strides = [1, 1]} : vector<8x5xf32> to vector<8x1xf32>
    %48 = vector.broadcast %47 : vector<8x1xf32> to vector<8x130xf32>
    %49 = vector.broadcast %7 : vector<1x130xf32> to vector<8x130xf32>
    %50 = arith.mulf %48, %49 : vector<8x130xf32>
    %51 = arith.addf %46, %50 : vector<8x130xf32>
    %52 = vector.extract_strided_slice %2 {offsets = [0, 2], sizes = [8, 1], strides = [1, 1]} : vector<8x5xf32> to vector<8x1xf32>
    %53 = vector.broadcast %52 : vector<8x1xf32> to vector<8x130xf32>
    %54 = vector.broadcast %8 : vector<1x130xf32> to vector<8x130xf32>
    %55 = arith.mulf %53, %54 : vector<8x130xf32>
    %56 = arith.addf %51, %55 : vector<8x130xf32>
    %57 = vector.extract_strided_slice %2 {offsets = [0, 3], sizes = [8, 1], strides = [1, 1]} : vector<8x5xf32> to vector<8x1xf32>
    %58 = vector.broadcast %57 : vector<8x1xf32> to vector<8x130xf32>
    %59 = vector.broadcast %9 : vector<1x130xf32> to vector<8x130xf32>
    %60 = arith.mulf %58, %59 : vector<8x130xf32>
    %61 = arith.addf %56, %60 : vector<8x130xf32>
    %62 = vector.extract_strided_slice %2 {offsets = [0, 4], sizes = [8, 1], strides = [1, 1]} : vector<8x5xf32> to vector<8x1xf32>
    %63 = vector.broadcast %62 : vector<8x1xf32> to vector<8x130xf32>
    %64 = vector.broadcast %10 : vector<1x130xf32> to vector<8x130xf32>
    %65 = arith.mulf %63, %64 : vector<8x130xf32>
    %66 = arith.addf %61, %65 : vector<8x130xf32>
    %67 = arith.maximumf %40, %66 : vector<8x130xf32>
    %cst = arith.constant 0.000000e+00 : f32
    %68 = vector.broadcast %cst : f32 to vector<8x130xf32>
    %69 = arith.maximumf %67, %68 : vector<8x130xf32>
    %70 = vector.extract_strided_slice %2 {offsets = [0, 0], sizes = [8, 1], strides = [1, 1]} : vector<8x5xf32> to vector<8x1xf32>
    %71 = vector.broadcast %70 : vector<8x1xf32> to vector<8x130xf32>
    %72 = vector.broadcast %8 : vector<1x130xf32> to vector<8x130xf32>
    %73 = arith.mulf %71, %72 : vector<8x130xf32>
    %74 = vector.broadcast %3 : vector<8x1xf32> to vector<8x130xf32>
    %75 = arith.addf %74, %73 : vector<8x130xf32>
    %76 = vector.extract_strided_slice %2 {offsets = [0, 1], sizes = [8, 1], strides = [1, 1]} : vector<8x5xf32> to vector<8x1xf32>
    %77 = vector.broadcast %76 : vector<8x1xf32> to vector<8x130xf32>
    %78 = vector.broadcast %9 : vector<1x130xf32> to vector<8x130xf32>
    %79 = arith.mulf %77, %78 : vector<8x130xf32>
    %80 = arith.addf %75, %79 : vector<8x130xf32>
    %81 = vector.extract_strided_slice %2 {offsets = [0, 2], sizes = [8, 1], strides = [1, 1]} : vector<8x5xf32> to vector<8x1xf32>
    %82 = vector.broadcast %81 : vector<8x1xf32> to vector<8x130xf32>
    %83 = vector.broadcast %10 : vector<1x130xf32> to vector<8x130xf32>
    %84 = arith.mulf %82, %83 : vector<8x130xf32>
    %85 = arith.addf %80, %84 : vector<8x130xf32>
    %86 = vector.extract_strided_slice %2 {offsets = [0, 3], sizes = [8, 1], strides = [1, 1]} : vector<8x5xf32> to vector<8x1xf32>
    %87 = vector.broadcast %86 : vector<8x1xf32> to vector<8x130xf32>
    %88 = vector.broadcast %11 : vector<1x130xf32> to vector<8x130xf32>
    %89 = arith.mulf %87, %88 : vector<8x130xf32>
    %90 = arith.addf %85, %89 : vector<8x130xf32>
    %91 = vector.extract_strided_slice %2 {offsets = [0, 4], sizes = [8, 1], strides = [1, 1]} : vector<8x5xf32> to vector<8x1xf32>
    %92 = vector.broadcast %91 : vector<8x1xf32> to vector<8x130xf32>
    %93 = vector.broadcast %12 : vector<1x130xf32> to vector<8x130xf32>
    %94 = arith.mulf %92, %93 : vector<8x130xf32>
    %95 = arith.addf %90, %94 : vector<8x130xf32>
    %96 = vector.extract_strided_slice %2 {offsets = [0, 0], sizes = [8, 1], strides = [1, 1]} : vector<8x5xf32> to vector<8x1xf32>
    %97 = vector.broadcast %96 : vector<8x1xf32> to vector<8x130xf32>
    %98 = vector.broadcast %10 : vector<1x130xf32> to vector<8x130xf32>
    %99 = arith.mulf %97, %98 : vector<8x130xf32>
    %100 = vector.broadcast %3 : vector<8x1xf32> to vector<8x130xf32>
    %101 = arith.addf %100, %99 : vector<8x130xf32>
    %102 = vector.extract_strided_slice %2 {offsets = [0, 1], sizes = [8, 1], strides = [1, 1]} : vector<8x5xf32> to vector<8x1xf32>
    %103 = vector.broadcast %102 : vector<8x1xf32> to vector<8x130xf32>
    %104 = vector.broadcast %11 : vector<1x130xf32> to vector<8x130xf32>
    %105 = arith.mulf %103, %104 : vector<8x130xf32>
    %106 = arith.addf %101, %105 : vector<8x130xf32>
    %107 = vector.extract_strided_slice %2 {offsets = [0, 2], sizes = [8, 1], strides = [1, 1]} : vector<8x5xf32> to vector<8x1xf32>
    %108 = vector.broadcast %107 : vector<8x1xf32> to vector<8x130xf32>
    %109 = vector.broadcast %12 : vector<1x130xf32> to vector<8x130xf32>
    %110 = arith.mulf %108, %109 : vector<8x130xf32>
    %111 = arith.addf %106, %110 : vector<8x130xf32>
    %112 = vector.extract_strided_slice %2 {offsets = [0, 3], sizes = [8, 1], strides = [1, 1]} : vector<8x5xf32> to vector<8x1xf32>
    %113 = vector.broadcast %112 : vector<8x1xf32> to vector<8x130xf32>
    %114 = vector.broadcast %13 : vector<1x130xf32> to vector<8x130xf32>
    %115 = arith.mulf %113, %114 : vector<8x130xf32>
    %116 = arith.addf %111, %115 : vector<8x130xf32>
    %117 = vector.extract_strided_slice %2 {offsets = [0, 4], sizes = [8, 1], strides = [1, 1]} : vector<8x5xf32> to vector<8x1xf32>
    %118 = vector.broadcast %117 : vector<8x1xf32> to vector<8x130xf32>
    %119 = vector.broadcast %14 : vector<1x130xf32> to vector<8x130xf32>
    %120 = arith.mulf %118, %119 : vector<8x130xf32>
    %121 = arith.addf %116, %120 : vector<8x130xf32>
    %122 = arith.maximumf %95, %121 : vector<8x130xf32>
    %cst_6 = arith.constant 0.000000e+00 : f32
    %123 = vector.broadcast %cst_6 : f32 to vector<8x130xf32>
    %124 = arith.maximumf %122, %123 : vector<8x130xf32>
    %125 = tpu.iota {dimensions = array<i32: 1>} : vector<8x130xi32>
    %c1_i32 = arith.constant 1 : i32
    %126 = vector.broadcast %c1_i32 : i32 to vector<8x130xi32>
    %127 = arith.cmpi sge, %125, %126 : vector<8x130xi32>
    %c2_i32 = arith.constant 2 : i32
    %128 = vector.broadcast %c2_i32 : i32 to vector<8x130xi32>
    %129 = arith.muli %128, %125 : vector<8x130xi32>
    %c31_i32 = arith.constant 31 : i32
    %130 = vector.broadcast %c31_i32 : i32 to vector<8x130xi32>
    %131 = arith.cmpi sle, %129, %130 : vector<8x130xi32>
    %132 = arith.andi %127, %131 : vector<8x130xi1>
    %cst_7 = arith.constant 0.000000e+00 : f32
    %133 = vector.broadcast %cst_7 : f32 to vector<8x130xf32>
    %134 = arith.select %132, %69, %133 : vector<8x130xi1>, vector<8x130xf32>
    %c2_i32_8 = arith.constant 2 : i32
    %135 = vector.broadcast %c2_i32_8 : i32 to vector<8x130xi32>
    %136 = arith.muli %135, %125 : vector<8x130xi32>
    %c31_i32_9 = arith.constant 31 : i32
    %137 = vector.broadcast %c31_i32_9 : i32 to vector<8x130xi32>
    %138 = arith.cmpi slt, %136, %137 : vector<8x130xi32>
    %cst_10 = arith.constant 0.000000e+00 : f32
    %139 = vector.broadcast %cst_10 : f32 to vector<8x130xf32>
    %140 = arith.select %138, %124, %139 : vector<8x130xi1>, vector<8x130xf32>
    %141 = tpu.concatenate %134, %140 in 0 : vector<8x130xf32>, vector<8x130xf32> -> vector<16x130xf32>
    %c0_11 = arith.constant 0 : index
    %c0_12 = arith.constant 0 : index
    %c0_13 = arith.constant 0 : index
    %142 = vector.load %arg4[%c0_11, %c0_12, %c0_13] : memref<3x32x16xf32, #tpu.memory_space<vmem>>, vector<1x32x16xf32>
    %143 = vector.shape_cast %142 : vector<1x32x16xf32> to vector<32x16xf32>
    %144 = vector.extract_strided_slice %141 {offsets = [0, 0], sizes = [16, 128], strides = [1, 1]} : vector<16x130xf32> to vector<16x128xf32>
    %cst_14 = arith.constant dense<0.000000e+00> : vector<32x128xf32>
    %145 = tpu.matmul %143, %144, %cst_14 {dimension_numbers = #tpu.dot_dimension_numbers<[1], [0], [0], [1], [0, 0, 1, 1], [], []>} : vector<32x16xf32>, vector<16x128xf32>, vector<32x128xf32> -> vector<32x128xf32>
    %c1 = arith.constant 1 : index
    %c0_15 = arith.constant 0 : index
    %c0_16 = arith.constant 0 : index
    %146 = vector.load %arg4[%c1, %c0_15, %c0_16] : memref<3x32x16xf32, #tpu.memory_space<vmem>>, vector<1x32x16xf32>
    %147 = vector.shape_cast %146 : vector<1x32x16xf32> to vector<32x16xf32>
    %148 = vector.extract_strided_slice %141 {offsets = [0, 1], sizes = [16, 128], strides = [1, 1]} : vector<16x130xf32> to vector<16x128xf32>
    %cst_17 = arith.constant dense<0.000000e+00> : vector<32x128xf32>
    %149 = tpu.matmul %147, %148, %cst_17 {dimension_numbers = #tpu.dot_dimension_numbers<[1], [0], [0], [1], [0, 0, 1, 1], [], []>} : vector<32x16xf32>, vector<16x128xf32>, vector<32x128xf32> -> vector<32x128xf32>
    %150 = arith.addf %145, %149 : vector<32x128xf32>
    %c2 = arith.constant 2 : index
    %c0_18 = arith.constant 0 : index
    %c0_19 = arith.constant 0 : index
    %151 = vector.load %arg4[%c2, %c0_18, %c0_19] : memref<3x32x16xf32, #tpu.memory_space<vmem>>, vector<1x32x16xf32>
    %152 = vector.shape_cast %151 : vector<1x32x16xf32> to vector<32x16xf32>
    %153 = vector.extract_strided_slice %141 {offsets = [0, 2], sizes = [16, 128], strides = [1, 1]} : vector<16x130xf32> to vector<16x128xf32>
    %cst_20 = arith.constant dense<0.000000e+00> : vector<32x128xf32>
    %154 = tpu.matmul %152, %153, %cst_20 {dimension_numbers = #tpu.dot_dimension_numbers<[1], [0], [0], [1], [0, 0, 1, 1], [], []>} : vector<32x16xf32>, vector<16x128xf32>, vector<32x128xf32> -> vector<32x128xf32>
    %155 = arith.addf %150, %154 : vector<32x128xf32>
    %156 = vector.extract_strided_slice %155 {offsets = [0, 0], sizes = [16, 128], strides = [1, 1]} : vector<32x128xf32> to vector<16x128xf32>
    %157 = vector.extract_strided_slice %155 {offsets = [16, 0], sizes = [16, 128], strides = [1, 1]} : vector<32x128xf32> to vector<16x128xf32>
    %158 = arith.maximumf %156, %157 : vector<16x128xf32>
    %c0_21 = arith.constant 0 : index
    %c0_22 = arith.constant 0 : index
    %159 = vector.load %arg5[%c0_21, %c0_22] : memref<16x1xf32, #tpu.memory_space<vmem>>, vector<16x1xf32>
    %160 = vector.broadcast %159 : vector<16x1xf32> to vector<16x128xf32>
    %161 = arith.addf %158, %160 : vector<16x128xf32>
    %cst_23 = arith.constant 0.000000e+00 : f32
    %162 = vector.broadcast %cst_23 : f32 to vector<16x128xf32>
    %163 = arith.maximumf %161, %162 : vector<16x128xf32>
    %164 = tpu.iota {dimensions = array<i32: 1>} : vector<1x128xi32>
    %c0_24 = arith.constant 0 : index
    %c0_25 = arith.constant 0 : index
    %165 = vector.load %arg7[%c0_24, %c0_25] : memref<1x128xf32, #tpu.memory_space<vmem>>, vector<1x128xf32>
    %c0_26 = arith.constant 0 : index
    %c0_27 = arith.constant 0 : index
    %c0_28 = arith.constant 0 : index
    %166 = vector.load %arg6[%c0_26, %c0_27, %c0_28] : memref<2x16x128xf32, #tpu.memory_space<vmem>>, vector<1x16x128xf32>
    %167 = vector.shape_cast %166 : vector<1x16x128xf32> to vector<16x128xf32>
    %168 = arith.mulf %167, %163 : vector<16x128xf32>
    %cst_29 = arith.constant dense<0.000000e+00> : vector<16xf32>
    %169 = vector.multi_reduction <add>, %168, %cst_29 [1] : vector<16x128xf32> to vector<16xf32>
    %170 = vector.shape_cast %169 : vector<16xf32> to vector<16x1xf32>
    %cst_30 = arith.constant dense<0.000000e+00> : vector<1xf32>
    %171 = vector.multi_reduction <add>, %170, %cst_30 [0] : vector<16x1xf32> to vector<1xf32>
    %172 = vector.shape_cast %171 : vector<1xf32> to vector<1x1xf32>
    %c0_i32 = arith.constant 0 : i32
    %173 = vector.broadcast %c0_i32 : i32 to vector<1x128xi32>
    %174 = arith.cmpi eq, %164, %173 : vector<1x128xi32>
    %cst_31 = arith.constant 0.000000e+00 : f32
    %175 = vector.shape_cast %172 : vector<1x1xf32> to vector<1x1xf32>
    %176 = vector.broadcast %175 : vector<1x1xf32> to vector<1x128xf32>
    %177 = vector.broadcast %cst_31 : f32 to vector<1x128xf32>
    %178 = arith.select %174, %176, %177 : vector<1x128xi1>, vector<1x128xf32>
    %179 = arith.addf %165, %178 : vector<1x128xf32>
    %c1_32 = arith.constant 1 : index
    %c0_33 = arith.constant 0 : index
    %c0_34 = arith.constant 0 : index
    %180 = vector.load %arg6[%c1_32, %c0_33, %c0_34] : memref<2x16x128xf32, #tpu.memory_space<vmem>>, vector<1x16x128xf32>
    %181 = vector.shape_cast %180 : vector<1x16x128xf32> to vector<16x128xf32>
    %182 = arith.mulf %181, %163 : vector<16x128xf32>
    %cst_35 = arith.constant dense<0.000000e+00> : vector<16xf32>
    %183 = vector.multi_reduction <add>, %182, %cst_35 [1] : vector<16x128xf32> to vector<16xf32>
    %184 = vector.shape_cast %183 : vector<16xf32> to vector<16x1xf32>
    %cst_36 = arith.constant dense<0.000000e+00> : vector<1xf32>
    %185 = vector.multi_reduction <add>, %184, %cst_36 [0] : vector<16x1xf32> to vector<1xf32>
    %186 = vector.shape_cast %185 : vector<1xf32> to vector<1x1xf32>
    %c1_i32_37 = arith.constant 1 : i32
    %187 = vector.broadcast %c1_i32_37 : i32 to vector<1x128xi32>
    %188 = arith.cmpi eq, %164, %187 : vector<1x128xi32>
    %cst_38 = arith.constant 0.000000e+00 : f32
    %189 = vector.shape_cast %186 : vector<1x1xf32> to vector<1x1xf32>
    %190 = vector.broadcast %189 : vector<1x1xf32> to vector<1x128xf32>
    %191 = vector.broadcast %cst_38 : f32 to vector<1x128xf32>
    %192 = arith.select %188, %190, %191 : vector<1x128xi1>, vector<1x128xf32>
    %193 = arith.addf %179, %192 : vector<1x128xf32>
    %c0_39 = arith.constant 0 : index
    %c0_40 = arith.constant 0 : index
    %c0_41 = arith.constant 0 : index
    %194 = vector.load %arg8[%c0_39, %c0_40, %c0_41] : memref<1x1x128xf32, #tpu.memory_space<vmem>>, vector<1x1x128xf32>
    %195 = vector.shape_cast %194 : vector<1x1x128xf32> to vector<1x128xf32>
    %196 = vector.shape_cast %193 : vector<1x128xf32> to vector<1x1x128xf32>
    tpu.vector_store %arg8[%c0_39, %c0_40, %c0_41], %196 {strides = array<i32>} : memref<1x1x128xf32, #tpu.memory_space<vmem>>, vector<1x1x128xf32>,
    return
  }
  func.func @transform_0(%arg0: i32) -> (i32, i32, i32) {
    %c0_i32 = arith.constant 0 : i32
    %c0_i32_0 = arith.constant 0 : i32
    %c0_i32_1 = arith.constant 0 : i32
    return %arg0, %c0_i32, %c0_i32_0 : i32, i32, i32
  }
  func.func @transform_1(%arg0: i32) -> (i32, i32) {
    %c0_i32 = arith.constant 0 : i32
    %c0_i32_0 = arith.constant 0 : i32
    %c0_i32_1 = arith.constant 0 : i32
    return %c0_i32, %c0_i32_0 : i32, i32
  }
  func.func @transform_2(%arg0: i32) -> (i32, i32) {
    %c0_i32 = arith.constant 0 : i32
    %c0_i32_0 = arith.constant 0 : i32
    %c0_i32_1 = arith.constant 0 : i32
    return %c0_i32, %c0_i32_0 : i32, i32
  }
  func.func @transform_3(%arg0: i32) -> (i32, i32, i32) {
    %c0_i32 = arith.constant 0 : i32
    %c0_i32_0 = arith.constant 0 : i32
    %c0_i32_1 = arith.constant 0 : i32
    %c0_i32_2 = arith.constant 0 : i32
    return %c0_i32, %c0_i32_0, %c0_i32_1 : i32, i32, i32
  }
  func.func @transform_4(%arg0: i32) -> (i32, i32) {
    %c0_i32 = arith.constant 0 : i32
    %c0_i32_0 = arith.constant 0 : i32
    %c0_i32_1 = arith.constant 0 : i32
    return %c0_i32, %c0_i32_0 : i32, i32
  }
  func.func @transform_5(%arg0: i32) -> (i32, i32, i32) {
    %c0_i32 = arith.constant 0 : i32
    %c0_i32_0 = arith.constant 0 : i32
    %c0_i32_1 = arith.constant 0 : i32
    %c0_i32_2 = arith.constant 0 : i32
    return %c0_i32, %c0_i32_0, %c0_i32_1 : i32, i32, i32
  }
  func.func @transform_6(%arg0: i32) -> (i32, i32) {
    %c0_i32 = arith.constant 0 : i32
    %c0_i32_0 = arith.constant 0 : i32
    %c0_i32_1 = arith.constant 0 : i32
    return %c0_i32, %c0_i32_0 : i32, i32
  }
  func.func @transform_7(%arg0: i32) -> (i32, i32, i32) {
    %c0_i32 = arith.constant 0 : i32
    %c0_i32_0 = arith.constant 0 : i32
    %c0_i32_1 = arith.constant 0 : i32
    return %arg0, %c0_i32, %c0_i32_0 : i32, i32, i32
  }
}

</mosaic_0001>

<bundles_post_ra>
// kernel: audio_encoder_forward.1
= control target key start
LH: loop header
LB: loop body
LE: loop exit
PB: predicated region body
PF: predicated region fallthrough
CT: control target
= control target key end

     0   :  { %12 = vsyncpa [#allocation3], 0  ;;  %s1264_s0 = inlined_call_operand.vmem [shape: f32[2,8,256], index: 0, kind: input, shape index: {}]   ;;  %s1265_s1 = inlined_call_operand.vmem [shape: f32[8,5], index: 1, kind: input, shape index: {}]   ;;  %s1266_s2 = inlined_call_operand.vmem [shape: f32[8,1], index: 2, kind: input, shape index: {}]   ;;  %s1267_s3 = inlined_call_operand.vmem [shape: f32[3,32,16], index: 3, kind: input, shape index: {}]   ;;  %s1268_s4 = inlined_call_operand.vmem [shape: f32[16,1], index: 4, kind: input, shape index: {}]   ;;  %s1269_s5 = inlined_call_operand.vmem [shape: f32[2,16,128], index: 5, kind: input, shape index: {}]   ;;  %s1270_s6 = inlined_call_operand.vmem [shape: f32[1,128], index: 6, kind: input, shape index: {}]   ;;  %s1271_s7 = inlined_call_operand.hbm [shape: f32[2,1,128], index: 7, kind: output, shape index: {}]  }
   0x1   :  { %14 = vsyncpa [#allocation3 + $0x1], 0  ;;  %s991_s24 = smov 0   ;;  %s993_s25 = smov 0  }
   0x2   :  { %s995_s26 = smov 0   ;;  %s997_s27 = smov 0  }
   0x3 LB: > { %s1012_s28 = sadd.s32 4294967295, %s942_s27   ;;  %s769_s29 = sadd.s32 4294967294, %s942_s27   ;;  %s942_s27 = sphi %s997_s27, %s1281_s27   ;;  %s938_s26 = sphi %s995_s26, %s1280_s26   ;;  %s934_s25 = sphi %s993_s25, %s1279_s25   ;;  %s930_s24 = sphi %s991_s24, %s1278_s24  }
   0x4   : > { %s1016_s30 = sadd.s32 1, %s942_s27   ;;  %s179_s8 = sadd.s32 1, %s938_s26 }
   0x5   : > { %s176_s9 = ssub.s32 %s942_s27, %s1016_s30  ;;  %p189_p0 = scmp.ne.s32.totalorder %s938_s26, %s934_s25 }
   0x6   : > { %p177_p1 = scmp.eq.s32.totalorder %s176_s9, 0  ;;  %p190_p2 = scmp.eq.s32.totalorder %s1012_s28, 1 }
   0x7   : > { %p195_p3 = scmp.ne.s32.totalorder %s934_s25, %s930_s24  ;;  %p196_p4 = scmp.eq.s32.totalorder %s769_s29, 1 }
   0x8   : > { %s1027_s10 = scalar_select %p177_p1, %s938_s26, %s179_s8  }
   0x9   : > { %p1029_p5 = por %p190_p2, %p189_p0  ;;  %p1033_p6 = por %p196_p4, %p195_p3 }
   0xa   : > { %p772_p7 = scmp.ge.s32.totalorder %s942_s27, 1  ;;  %p240_p8 = scmp.lt.s32.totalorder %s942_s27, 3 }
   0xc   : > { %p241_p9 = pnand %p772_p7, %p240_p8 }
   0xd   : > { %p271_p10 = scmp.lt.s32.totalorder (!%p241_p9), %s1012_s28, 1  ;;  %s949_s22 = smov (!%p241_p9), 127  }
   0xe   : > { %244 = sbr.rel (%p241_p9) target bundleno = 720 (0x2d0), region = 48  ;;  %s950_s23 = smov (!%p241_p9), 126  }
  0x13   : > { %v278_v0 = vld [vmem:[%s1265_s1] sm:$0xff]  ;;  %v944_v1 = vmov 3   ;;  %v945_v2 = vmov 1   ;;  %v946_v3 = vmov 0   ;;  %v947_v5 = vmov 4   ;;  %s272_s17 = scalar_select %p271_p10, %s1012_s28, 1 }
  0x14   : > { %857 = vset.pattern.permute.xlu2 %v944_v1  ;;  %855 = vset.pattern.permute.xlu1 %v945_v2  ;;  %v279_v4 = vld [vmem:[%s1266_s2] sm:$0xff]  ;;  %v948_v6 = vmov 2   ;;  %vm340_vm0 = vcmask 1039360   ;;  %vm498_vm7 = vcmask 130048   ;;  %vm594_vm8 = vcmask 1031168  }
  0x15   : > { %854 = vset.pattern.permute.xlu0 %v946_v3  ;;  %317 = vperm.xlu2 %857, %v278_v0   ;;  %s801_s18 = sshll.u32 %s272_s17, 4  ;;  %s900_s17 = scalar_lea.hbm %s1271_s7, 2 }
  0x16   : > { %297 = vperm.xlu1 %855, %v278_v0   ;;  %282 = vperm.xlu0 %854, %v278_v0   ;;  %s275_s21 = scalar_lea.vmem %s1264_s0, %s801_s18  ;;  %s269_s18 = sand.u32 1, %s934_s25  }
  0x17   : > { %v276_v7 = vld [vmem:[%s275_s21] sm:$0xff]  ;;  %v1054_v11 = vld [vmem:[%s275_s21 + $0x8] sm:$0xff]  ;;  %s710_s21 = scalar_lea.hbm %s1271_s7, %s1012_s28  ;;  %s270_s29 = scalar_lea.vmem [#allocation2], %s269_s18 }
  0x18   : > { %v367_v8 = vperm.slane %v276_v7, 1  ;;  %v331_v12 = vperm.slane %v1054_v11, 0  ;;  %v321_v13 = vperm.slane %v1054_v11, 7  ;;  %v320_v17 = vperm.slane %v276_v7, 7  ;;  %s712_s8 = sshll.u32 %s270_s29, 4  ;;  %s714_s9 = sshll.u32 %s710_s21, 4  ;;  %s713_s8 = int_to_ptr.vmem [resolvable:$true] %s712_s8  ;;  %s715_s9 = int_to_ptr.hbm [resolvable:$true] %s714_s9 }
  0x19   : > { %v1069_v19 = vperm.slane %v1054_v11, 4  ;;  %v301_v20 = vperm.slane %v1054_v11, 5  ;;  %v1073_v21 = vperm.slane %v1054_v11, 6  ;;  %v285_v24 = vperm.slane %v276_v7, 4  ;;  %s702_s28 = scalar_lea.sflag [#allocation3], %s269_s18  ;;  %s894_s13 = sshra.s32 %s715_s9, 4  ;;  %s895_s13 = int_to_ptr.hbm [resolvable:$true] %s894_s13 }
  0x1a   : > { %v300_v25 = vperm.slane %v276_v7, 5  ;;  %v1075_v26 = vperm.slane %v276_v7, 6  ;;  %v330_v27 = vperm.slane %v276_v7, 0  ;;  %v1077_v28 = vperm.slane %v276_v7, 2  ;;  %s896_s14 = scalar_lea.hbm %s895_s13, 1  ;;  %p901_p0 = scmp.lt.s32.totalorder %s895_s13, %s1271_s7 }
  0x1b   : > { %v1080_v29 = vperm.slane %v1054_v11, 2  ;;  %v368_v30 = vperm.slane %v1054_v11, 1  ;;  %v413_v31 = vperm.slane %v276_v7, 3  ;;  %v414_v47 = vperm.slane %v1054_v11, 3  ;;  %p897_p11 = scmp.ne.s32.totalorder %s895_s13, %s896_s14  ;;  %p902_p1 = scmp.lt.s32.totalorder %s900_s17, %s896_s14 }
  0x1d   : > { %858 = vset.pattern.permute.xlu2 %v947_v5  ;;  %p898_p12 = pnand %p897_p11, %p1029_p5  ;;  %p903_p2 = por %p902_p1, %p901_p0 }
  0x1e   : > { %856 = vset.pattern.permute.xlu1 %v948_v6  ;;  %291 = vperm.xlu0 %854, %v279_v4  }
  0x1f   : > { %327 = vperm.xlu2 %858, %v278_v0   ;;  %307 = vperm.xlu1 %856, %v278_v0   ;;  %p899_p13 = pneg %p898_p12 }
  0x21   : > { %p904_p3 = pnand %p903_p2, %p899_p13 }
  0x27   : > { %879 = vset.pattern.permute.xlu2 %v946_v3 }
  0x6f   : > { %v1050_v9 = vpop.permute.xlu2 %317 }
  0x70   : > { %v369_v10 = vmul.f32 %v367_v8, %v1050_v9  ;;  %v1059_v14 = vmul.f32 %v321_v13, %v1050_v9  ;;  %v1066_v18 = vmul.f32 %v320_v17, %v1050_v9  ;;  %v370_v44 = vmul.f32 %v368_v30, %v1050_v9 }
  0x71   : > { %v415_v45 = vmul.f32 %v413_v31, %v1050_v9  ;;  %v435_v46 = vmul.f32 %v1050_v9, %v300_v25 }
  0x72   : > { %373 = vrot.lane.b32.xlu2 %v369_v10, %s949_s22 }
  0x79   : > { %v1061_v15 = vpop.permute.xlu2 %327 }
  0x7a   : > { %v333_v16 = vmul.f32 %v331_v12, %v1061_v15  ;;  %v419_v51 = vmul.f32 %v1061_v15, %v285_v24  ;;  %v439_v0 = vmul.f32 %v1061_v15, %v1075_v26 }
  0x7c   : > { %338 = vrot.lane.b32.xlu2 %v333_v16, %s949_s22 }
  0x88   : > { %v298_v22 = vpop.permute.xlu1 %297  ;;  %v283_v23 = vpop.permute.xlu0 %282 }
  0x89   : > { %v288_v32 = vmul.f32 %v1069_v19, %v283_v23  ;;  %v303_v33 = vmul.f32 %v301_v20, %v298_v22  ;;  %v347_v34 = vmul.f32 %v1073_v21, %v283_v23  ;;  %v351_v35 = vmul.f32 %v321_v13, %v298_v22 }
  0x8a   : > { %v346_v36 = vmul.f32 %v1075_v26, %v283_v23  ;;  %v350_v37 = vmul.f32 %v320_v17, %v298_v22  ;;  %v287_v38 = vmul.f32 %v285_v24, %v283_v23  ;;  %v302_v39 = vmul.f32 %v300_v25, %v298_v22 }
  0x8b   : > { %v401_v40 = vmul.f32 %v330_v27, %v283_v23  ;;  %v402_v41 = vmul.f32 %v331_v12, %v283_v23  ;;  %v423_v42 = vmul.f32 %v1077_v28, %v283_v23  ;;  %v424_v43 = vmul.f32 %v1080_v29, %v283_v23 }
  0x8c   : > { %v406_v49 = vmul.f32 %v368_v30, %v298_v22  ;;  %v405_v50 = vmul.f32 %v367_v8, %v298_v22  ;;  %v427_v52 = vmul.f32 %v413_v31, %v298_v22  ;;  %v428_v1 = vmul.f32 %v414_v47, %v298_v22 }
  0x8d   : > { %v416_v23 = vmul.f32 %v414_v47, %v1050_v9  ;;  %v332_v25 = vmul.f32 %v330_v27, %v1061_v15 }
  0x90   : > { %v292_v48 = vpop.permute.xlu0 %291 }
  0x91   : > { %v308_v53 = vpop.permute.xlu1 %307  ;;  %v404_v54 = vadd.f32 %v402_v41, %v292_v48  ;;  %v403_v55 = vadd.f32 %v401_v40, %v292_v48  ;;  %v425_v56 = vadd.f32 %v423_v42, %v292_v48  ;;  %v426_v57 = vadd.f32 %v424_v43, %v292_v48 }
  0x92   : > { %v355_v58 = vmul.f32 %v331_v12, %v308_v53  ;;  %v354_v59 = vmul.f32 %v330_v27, %v308_v53  ;;  %v409_v60 = vmul.f32 %v1077_v28, %v308_v53  ;;  %v431_v61 = vmul.f32 %v308_v53, %v285_v24 }
  0x93   : > { %v407_v62 = vadd.f32 %v405_v50, %v403_v55  ;;  %v429_v63 = vadd.f32 %v427_v52, %v425_v56  ;;  %v408_v2 = vadd.f32 %v406_v49, %v404_v54  ;;  %v410_v3 = vmul.f32 %v1080_v29, %v308_v53 }
  0x94   : > { %360 = vrot.lane.b32.xlu1 %v355_v58, %s949_s22  ;;  %358 = vrot.lane.b32.xlu0 %v354_v59, %s949_s22  ;;  %v295_v4 = vadd.f32 %v292_v48, %v288_v32  ;;  %v430_v7 = vadd.f32 %v428_v1, %v426_v57  ;;  %v313_v8 = vmul.f32 %v1073_v21, %v308_v53  ;;  %v447_v49 = vlaneseq }
  0x95   : > { %v411_v5 = vadd.f32 %v409_v60, %v407_v62  ;;  %v433_v6 = vadd.f32 %v431_v61, %v429_v63  ;;  %v432_v10 = vmul.f32 %v308_v53, %v1069_v19  ;;  %v349_v13 = vadd.f32 %v347_v34, %v292_v48 }
  0x96   : > { %v305_v12 = vadd.f32 %v303_v33, %v295_v4  ;;  %v348_v16 = vadd.f32 %v346_v36, %v292_v48  ;;  %v294_v24 = vadd.f32 %v292_v48, %v287_v38  ;;  %v436_v42 = vmul.f32 %v1050_v9, %v301_v20 }
  0x97   : > { %v417_v17 = vadd.f32 %v415_v45, %v411_v5  ;;  %v437_v22 = vadd.f32 %v435_v46, %v433_v6  ;;  %v353_v31 = vadd.f32 %v351_v35, %v349_v13  ;;  %v412_v33 = vadd.f32 %v410_v3, %v408_v2 }
  0x98   : > { %v315_v30 = vadd.f32 %v313_v8, %v305_v12  ;;  %v352_v32 = vadd.f32 %v350_v37, %v348_v16  ;;  %v304_v43 = vadd.f32 %v302_v39, %v294_v24  ;;  %v434_v34 = vadd.f32 %v432_v10, %v430_v7  ;;  %v663_v7 = vld [vmem:[%s1269_s5] sm:$0xff] }
  0x99   : > { %v421_v40 = vadd.f32 %v419_v51, %v417_v17  ;;  %v441_v41 = vadd.f32 %v439_v0, %v437_v22  ;;  %v312_v45 = vmul.f32 %v1075_v26, %v308_v53  ;;  %v420_v37 = vmul.f32 %v1061_v15, %v1069_v19 }
  0x9a   : > { %v325_v36 = vadd.f32 %v1059_v14, %v315_v30  ;;  %v418_v11 = vadd.f32 %v416_v23, %v412_v33  ;;  %v438_v38 = vadd.f32 %v436_v42, %v434_v34  ;;  %v440_v9 = vmul.f32 %v1061_v15, %v1073_v21  ;;  %v476_v42 = vld [vmem:[%s1267_s3 + $0x18] sm:$0xff] }
  0x9b   : > { %v443_v46 = vmax.f32 %v421_v40, %v441_v41  ;;  %v314_v27 = vadd.f32 %v312_v45, %v304_v43  ;;  %v384_v14 = vmul.f32 %v1077_v28, %v1061_v15  ;;  %v385_v26 = vmul.f32 %v1080_v29, %v1061_v15  ;;  %v475_v40 = vld [vmem:[%s1267_s3 + $0x10] sm:$0xff]  ;;  %v646_v43 = vld [vmem:[%s1268_s4] sm:$0xff] }
  0x9c   : > { %375 = vrot.lane.b32.xlu0 %v370_v44, %s949_s22  ;;  %336 = vrot.lane.b32.xlu1 %v332_v25, %s949_s22  ;;  %v422_v39 = vadd.f32 %v420_v37, %v418_v11  ;;  %v442_v44 = vadd.f32 %v440_v9, %v438_v38  ;;  %v1125_v51 = vand.u32 127, %v447_v49  ;;  %v776_v9 = vld [vmem:[%s1267_s3 + $0x28] sm:$0xff]  ;;  %v778_v49 = vld [vmem:[%s1267_s3 + $0x38] sm:$0xff] }
  0x9d   : > { %v445_v35 = vmax.f32 %v443_v46, 0.0  ;;  %v324_v20 = vadd.f32 %v1066_v18, %v314_v27 }
  0x9e   : > { %v444_v19 = vmax.f32 %v422_v39, %v442_v44  ;;  %v449_v29 = vadd.s32 128, %v1125_v51  ;;  %v452_v56 = vmul.u32 2, %v1125_v51  ;;  %vm450_vm1 = vcmp.ge.s32.totalorder %v1125_v51, 1 }
  0x9f   : > { %464 = vrot.lane.b32.xlu2 %v445_v35, %s949_s22  ;;  %vm678_vm9 = vcmp.eq.s32.totalorder %v1125_v51, 0  ;;  %vm697_vm10 = vcmp.eq.s32.totalorder %v1125_v51, 1 }
  0xa0   : > { %v446_v47 = vmax.f32 %v444_v19, 0.0  ;;  %v453_v62 = vmul.u32 2, %v449_v29  ;;  %vm454_vm2 = vcmp.le.s32.totalorder %v452_v56, 31  ;;  %vm1138_vm6 = vcmp.lt.s32.totalorder %v452_v56, 31  ;;  %v790_v19 = vld [vmem:[%s1267_s3 + $0x48] sm:$0xff] }
  0xa1   : > { %vm1134_vm4 = vmand %vm450_vm1, %vm454_vm2 }
  0xa2   : > { %vm455_vm3 = vcmp.le.s32.totalorder %v453_v62, 31  ;;  %vm461_vm5 = vcmp.lt.s32.totalorder %v453_v62, 31 }
  0xa4   : > { %388 = vrot.lane.b32.xlu0 %v384_v14, %s949_s22  ;;  %390 = vrot.lane.b32.xlu1 %v385_v26, %s949_s22  ;;  %v775_v14 = vld [vmem:[%s1267_s3 + $0x20] sm:$0xff] }
  0xac   : > { %466 = vrot.lane.b32.xlu0 %v446_v47, %s949_s22 }
  0xcc   : > { %v374_v48 = vpop.permute.xlu2 %373 }
  0xd6   : > { %v339_v54 = vpop.permute.xlu2 %338 }
  0xd7   : > { %v345_v63 = vadd.f32 %v339_v54, %v325_v36 }
  0xf9   : > { %v465_v13 = vpop.permute.xlu2 %464 }
 0x106   : > { %v361_v21 = vpop.permute.xlu1 %360  ;;  %v359_v18 = vpop.permute.xlu0 %358 }
 0x107   : > { %v362_v15 = vsel %vm340_vm0, %v359_v18, %v361_v21  ;;  %v366_v52 = vadd.f32 %v361_v21, %v353_v31  ;;  %v647_v31 = vld [vmem:[%s1268_s4 + $0x8] sm:$0xff]  ;;  %v777_v21 = vld [vmem:[%s1267_s3 + $0x30] sm:$0xff]  ;;  %v473_v18 = vld [vmem:[%s1267_s3] sm:$0xff] }
 0x108   : > { %v365_v55 = vadd.f32 %v362_v15, %v352_v32  ;;  %v474_v32 = vld [vmem:[%s1267_s3 + $0x8] sm:$0xff] }
 0x10e   : > { %v376_v50 = vpop.permute.xlu0 %375  ;;  %v337_v28 = vpop.permute.xlu1 %336 }
 0x10f   : > { %v377_v53 = vsel %vm340_vm0, %v374_v48, %v376_v50  ;;  %v381_v57 = vadd.f32 %v376_v50, %v366_v52  ;;  %v341_v58 = vsel %vm340_vm0, %v337_v28, %v339_v54  ;;  %v791_v48 = vld [vmem:[%s1267_s3 + $0x50] sm:$0xff]  ;;  %v789_v50 = vld [vmem:[%s1267_s3 + $0x40] sm:$0xff]  ;;  %v792_v28 = vld [vmem:[%s1267_s3 + $0x58] sm:$0xff] }
 0x110   : > { %v380_v59 = vadd.f32 %v377_v53, %v365_v55  ;;  %v344_v2 = vadd.f32 %v341_v58, %v324_v20 }
 0x116   : > { %v389_v60 = vpop.permute.xlu0 %388  ;;  %v391_v61 = vpop.permute.xlu1 %390 }
 0x117   : > { %v392_v0 = vsel %vm340_vm0, %v389_v60, %v391_v61  ;;  %v396_v1 = vadd.f32 %v391_v61, %v381_v57 }
 0x118   : > { %v395_v3 = vadd.f32 %v392_v0, %v380_v59 }
 0x119   : > { %v398_v4 = vmax.f32 %v345_v63, %v396_v1 }
 0x11a   : > { %v397_v5 = vmax.f32 %v344_v2, %v395_v3 }
 0x11b   : > { %v400_v6 = vmax.f32 %v398_v4, 0.0 }
 0x11c   : > { %v399_v8 = vmax.f32 %v397_v5, 0.0 }
 0x11d   : > { %v459_v12 = vsel %vm455_vm3, %v400_v6, 0.0  ;;  %v797_v6 = vld [vmem:[%s1269_s5 + $0x10] sm:$0xff] }
 0x11e   : > { %v467_v16 = vpop.permute.xlu0 %466  ;;  %v458_v17 = vsel %vm1134_vm4, %v399_v8, 0.0 }
 0x11f   : > { %v472_v22 = vsel %vm461_vm5, %v467_v16, 0.0  ;;  %v468_v23 = vsel %vm340_vm0, %v465_v13, %v467_v16  ;;  %v859_v24 = vpack.i.bf16 %v459_v12, %v458_v17 }
 0x120   : > { %v471_v25 = vsel %vm1138_vm6, %v468_v23, 0.0  ;;  %804 = vmatpush.msk.msra.mxu1 %vm1138_vm6, %v468_v23 }
 0x121   : > { %860 = vrot.lane.b32.xlu2 %v859_v24, %s949_s22  ;;  %v869_v30 = vpack.i.bf16 %v472_v22, %v471_v25  ;;  %v664_v25 = vld [vmem:[%s1269_s5 + $0x8] sm:$0xff] }
 0x122   : > { %805 = vmatpush.msk.msra.mxu1 %vm1134_vm4, %v399_v8 }
 0x123   : > { %870 = vrot.lane.b32.xlu0 %v869_v30, %s950_s23  ;;  %865 = vrot.lane.b32.xlu1 %v869_v30, %s949_s22 }
 0x124   : > { %786 = vmatmul.msk.f32.vlgmr.msra.gmra.mxu1 %vm498_vm7, %v474_v32  ;;  %v798_v32 = vld [vmem:[%s1269_s5 + $0x18] sm:$0xff] }
 0x129   : > { %650 = vperm.xlu2 %879, %v646_v43  }
 0x12b   : > { %655 = vperm.xlu0 %854, %v647_v31   ;;  %875 = vrot.lane.b32.xlu1 %v859_v24, %s950_s23 }
 0x12c   : > { %787 = vmatmul.msk.f32.gmra.mxu1 %vm498_vm7, %v475_v40 }
 0x134   : > { %788 = vmatmul.msk.f32.gmra.mxu1 %vm498_vm7, %v476_v42 }
 0x17b   : > { %v861_v41 = vpop.permute.xlu2 %860 }
 0x17c   : > { %v863_v33 = vunpack.i.h.bf16 %v861_v41  ;;  %v862_v34 = vunpack.i.l.bf16 %v861_v41 }
 0x17e   : > { %v494_v20 = vsel %vm340_vm0, %v862_v34, %v863_v33 }
 0x183   : > { %v651_v63 = vpop.permute.xlu2 %650 }
 0x195   : > { %v871_v36 = vpop.permute.xlu0 %870  ;;  %v866_v45 = vpop.permute.xlu1 %865 }
 0x196   : > { %v873_v46 = vunpack.i.h.bf16 %v871_v36  ;;  %v872_v27 = vunpack.i.l.bf16 %v871_v36  ;;  %v868_v35 = vunpack.i.h.bf16 %v866_v45  ;;  %v867_v37 = vunpack.i.l.bf16 %v866_v45 }
 0x198   : > { %v495_v11 = vsel %vm340_vm0, %v867_v37, %v868_v35  ;;  %v596_v38 = vsel %vm594_vm8, %v872_v27, %v873_v46 }
 0x199   : > { %525 = vmatpush.msra.mxu0 %v495_v11  ;;  %802 = vmatpush.msra.mxu3 %v495_v11 }
 0x19a   : > { %806 = vmatpush.msra.mxu2 %v596_v38 }
 0x19b   : > { %526 = vmatpush.msra.mxu0 %v494_v20  ;;  %803 = vmatpush.msra.mxu3 %v494_v20 }
 0x19c   : > { %780 = vmatmul.msk.f32.vlgmr.msra.gmra.mxu3 %vm498_vm7, %v776_v9  ;;  %779 = vmatmul.msk.f32.vlgmr.msra.gmra.mxu0 %vm498_vm7, %v775_v14 }
 0x19d   : > { %783 = vmatpush.msk.msrb.mxu0 %vm1138_vm6, %v468_v23  ;;  %v876_v26 = vpop.permute.xlu1 %875  ;;  %v656_v23 = vpop.permute.xlu0 %655 }
 0x19e   : > { %v878_v39 = vunpack.i.h.bf16 %v876_v26  ;;  %v877_v44 = vunpack.i.l.bf16 %v876_v26 }
 0x19f   : > { %784 = vmatpush.msk.msrb.mxu0 %vm1134_vm4, %v399_v8 }
 0x1a0   : > { %v595_v47 = vsel %vm594_vm8, %v877_v44, %v878_v39  ;;  %v662_v39 = vld [vmem:[%s1270_s6] sm:$0x1] }
 0x1a1   : > { %625 = vmatpush.msra.mxu0 %v596_v38  ;;  %807 = vmatpush.msra.mxu2 %v595_v47  ;;  %v572_v29 = vpop.f32.mrf.mxu1 }
 0x1a2   : > { %794 = vmatmul.msk.f32.vlgmr.msra.gmra.mxu2 %vm498_vm7, %v790_v19 }
 0x1a3   : > { %626 = vmatpush.msra.mxu0 %v595_v47 }
 0x1a4   : > { %781 = vmatmul.msk.f32.gmra.mxu3 %vm498_vm7, %v777_v21  ;;  %785 = vmatmul.msk.f32.vlgmr.msrb.gmra.mxu0 %vm498_vm7, %v473_v18 }
 0x1a9   : > { %v575_v55 = vpop.f32.mrf.mxu1 }
 0x1aa   : > { %795 = vmatmul.msk.f32.gmra.mxu2 %vm498_vm7, %v791_v48 }
 0x1ac   : > { %782 = vmatmul.msk.f32.gmra.mxu3 %vm498_vm7, %v778_v49  ;;  %793 = vmatmul.msk.f32.vlgmr.msra.gmra.mxu0 %vm498_vm7, %v789_v50 }
 0x1b1   : > { %v578_v1 = vpop.f32.mrf.mxu1 }
 0x1b2   : > { %796 = vmatmul.msk.f32.gmra.mxu2 %vm498_vm7, %v792_v28 }
 0x219   : > { %v528_v15 = vpop.f32.mrf.mxu0 }
 0x21f   : > { %v531_v52 = vpop.f32.mrf.mxu3 }
 0x220   : > { %v573_v3 = vadd.f32 %v572_v29, %v531_v52 }
 0x221   : > { %v569_v53 = vpop.f32.mrf.mxu0 }
 0x222   : > { %v570_v57 = vadd.f32 %v569_v53, %v528_v15 }
 0x225   : > { %v631_v54 = vpop.f32.mrf.mxu2 }
 0x226   : > { %v641_v12 = vadd.f32 %v631_v54, %v573_v3 }
 0x227   : > { %v534_v56 = vpop.f32.mrf.mxu3 }
 0x228   : > { %v576_v58 = vadd.f32 %v575_v55, %v534_v56 }
 0x229   : > { %v628_v59 = vpop.f32.mrf.mxu0 }
 0x22a   : > { %v640_v60 = vadd.f32 %v628_v59, %v570_v57 }
 0x22d   : > { %v634_v61 = vpop.f32.mrf.mxu2 }
 0x22e   : > { %v642_v62 = vadd.f32 %v634_v61, %v576_v58 }
 0x22f   : > { %v537_v0 = vpop.f32.mrf.mxu3 }
 0x230   : > { %v644_v2 = vmax.f32 %v640_v60, %v642_v62  ;;  %v579_v5 = vadd.f32 %v578_v1, %v537_v0 }
 0x232   : > { %v658_v4 = vadd.f32 %v651_v63, %v644_v2 }
 0x234   : > { %v660_v8 = vmax.f32 %v658_v4, 0.0 }
 0x235   : > { %v637_v10 = vpop.f32.mrf.mxu2 }
 0x236   : > { %v643_v13 = vadd.f32 %v637_v10, %v579_v5  ;;  %v684_v16 = vmul.f32 %v797_v6, %v660_v8  ;;  %v665_v17 = vmul.f32 %v663_v7, %v660_v8 }
 0x238   : > { %v645_v22 = vmax.f32 %v641_v12, %v643_v13  ;;  %686 = vadd.xlane.f32.xlu0 %v684_v16  ;;  %667 = vadd.xlane.f32.xlu1 %v665_v17 }
 0x23a   : > { %v659_v24 = vadd.f32 %v656_v23, %v645_v22 }
 0x23c   : > { %v661_v30 = vmax.f32 %v659_v24, 0.0 }
 0x23e   : > { %v666_v31 = vmul.f32 %v664_v25, %v661_v30  ;;  %v685_v40 = vmul.f32 %v798_v32, %v661_v30 }
 0x240   : > { %669 = vadd.xlane.f32.xlu2 %v666_v31 }
 0x248   : > { %688 = vadd.xlane.f32.xlu2 %v685_v40 }
 0x2ab   : > { %v668_v41 = vpop.xlane.xlu1 %667  ;;  %v687_v45 = vpop.xlane.xlu0 %686 }
 0x2b3   : > { %v670_v42 = vpop.xlane.xlu2 %669 }
 0x2b4   : > { %v671_v43 = vadd.f32 %v670_v42, %v668_v41 }
 0x2b6   : > { %v672_v33 = vrot.slane %v671_v43, 4 }
 0x2b8   : > { %v673_v34 = vadd.f32 %v672_v33, %v671_v43 }
 0x2ba   : > { %v674_v36 = vrot.slane %v673_v34, 2 }
 0x2bb   : > { %v689_v46 = vpop.xlane.xlu2 %688 }
 0x2bc   : > { %v675_v27 = vadd.f32 %v674_v36, %v673_v34  ;;  %v690_v35 = vadd.f32 %v689_v46, %v687_v45 }
 0x2be   : > { %v676_v37 = vrot.slane %v675_v27, 1  ;;  %v691_v11 = vrot.slane %v690_v35, 4 }
 0x2c0   : > { %v692_v38 = vadd.f32 %v691_v11, %v690_v35  ;;  %v677_v9 = vadd.f32 %v676_v37, %v675_v27 }
 0x2c2   : > { %v693_v20 = vrot.slane %v692_v38, 2  ;;  %v679_v44 = vsel %vm678_vm9, %v677_v9, 0.0 }
 0x2c3   : > { %v680_v47 = vadd.f32 %v679_v44, %v662_v39 }
 0x2c4   : > { %v694_v14 = vadd.f32 %v693_v20, %v692_v38 }
 0x2c6   : > { %v695_v26 = vrot.slane %v694_v14, 1 }
 0x2c8   : > { %v696_v19 = vadd.f32 %v695_v26, %v694_v14 }
 0x2ca   : > { %v698_v21 = vsel %vm697_vm10, %v696_v19, 0.0 }
 0x2cb   : > { %v699_v18 = vadd.f32 %v698_v21, %v680_v47 }
 0x2cd   : > { %700 = vst [vmem:[%s270_s29] sm:$0x1] %v699_v18 }
 0x2ce   : > { %907 = shalt.err (!%p904_p3)
}
 0x2cf   : > { %808 = dma.vmem_to_hbm [thread:$0]  (%p1029_p5), %s713_s8, 16, %s715_s9, %s702_s28  }
 0x2d0 PF: > { %p814_p4 = scmp.ge.s32.totalorder %s942_s27, 2  ;;  %s726_s18 = sand.u32 1, %s930_s24  }
 0x2d1   : > { %s727_s21 = scalar_lea.sflag [#allocation3], %s726_s18 }
 0x2d2   : > { %p811_p7 = pnand %p814_p4, %p1033_p6 }
 0x2d4   : > { %p812_p8 = pneg %p811_p7 }
 0x2d6   : > { %925 = dma.done.wait (%p812_p8), %s727_s21, 16  }
 0x2d7   : > { %927 = vsyncadd (%p812_p8), %s727_s21, 4294967280  ;;  %p17_p9 = scmp.ge.s32.totalorder %s1016_s30, 4   ;;  %s1278_s24 = smov %s934_s25 }
 0x2d8   : > { %s1279_s25 = smov %s938_s26  ;;  %s1280_s26 = smov %s1027_s10 }
 0x2d9   : > { %s1281_s27 = smov %s1016_s30  ;;  %19 = sbr.rel (!%p17_p9) target bundleno = 3 (0x3), region = 86 }
 0x2de   :  { %732 = vsyncpa [#allocation3], 1 }
 0x2df   :  { %734 = vsyncpa [#allocation3 + $0x1], 1 }

</bundles_post_ra>
